<compile_context>
chip_gen: v6e
topology: v6e:2x2x1
jax: 0.10.0
libtpu: 0.0.40
codegen_flags: <defaults>
</compile_context>

<pallas_src>
import functools
import math

import jax
import jax.numpy as jnp
import numpy as np
from jax import lax
from jax.experimental import pallas as pl
from jax.experimental.pallas import tpu as pltpu


# ----------------------------------------------------------------------------
# Parameter / buffer construction (deterministic, mirrors nn.Module.__init__)
# ----------------------------------------------------------------------------
def make_positional_encoding_table(d_model, max_len=5000, dtype=jnp.float32):
    """pe[pos, 2i]   = sin(pos / 10000^(2i/d_model))
       pe[pos, 2i+1] = cos(pos / 10000^(2i/d_model))   -> shape [max_len, d_model]"""
    position = jnp.arange(max_len, dtype=jnp.float32)[:, None]            # [L, 1]
    div_term = jnp.exp(
        jnp.arange(0, d_model, 2, dtype=jnp.float32)
        * (-math.log(10000.0) / d_model)
    )                                                                      # [D/2]
    angles = position * div_term                                           # [L, D/2]
    pe = jnp.zeros((max_len, d_model), jnp.float32)
    pe = pe.at[:, 0::2].set(jnp.sin(angles))
    pe = pe.at[:, 1::2].set(jnp.cos(angles))
    return pe.astype(dtype)


# ----------------------------------------------------------------------------
# In-kernel counter-based hash (lowbias32 finalizer) — int32 ops only.
# ----------------------------------------------------------------------------
_C1 = 0x7FEB352D            # fits in int32
_C2 = -2073319797           # 0x846CA68B re-interpreted as int32
_GOLD = -1640531535         # 0x9E3779B1 re-interpreted as int32


def _lowbias32(x):
    x = jnp.bitwise_xor(x, lax.shift_right_logical(x, np.int32(16)))
    x = x * np.int32(_C1)
    x = jnp.bitwise_xor(x, lax.shift_right_logical(x, np.int32(15)))
    x = x * np.int32(_C2)
    x = jnp.bitwise_xor(x, lax.shift_right_logical(x, np.int32(16)))
    return x


# ----------------------------------------------------------------------------
# Pallas kernel: per (seq_tile, batch) step  out = dropout(x + pe)
# ----------------------------------------------------------------------------
def _pe_add_dropout_kernel(seed_ref, x_ref, pe_ref, o_ref, *,
                           dropout_p, training, seq_len, d_model, tile_rows):
    # x_ref / o_ref : (tile_rows, d_model)   pe_ref : (tile_rows, d_model)
    # compute in f32 (safe on v5e, exact for f32 I/O), I/O in x's dtype.
    y = x_ref[...].astype(jnp.float32) + pe_ref[...].astype(jnp.float32)

    if training and dropout_p > 0.0:
        si = pl.program_id(0)          # seq-tile index
        b = pl.program_id(1)           # batch index
        seed = seed_ref[0]             # SMEM scalar
        # Unique global element index -> unique random bits per element,
        # regardless of tiling (no stream replay across tiles or batches).
        base_row = b * np.int32(seq_len) + si * np.int32(tile_rows)
        row = lax.broadcasted_iota(jnp.int32, y.shape, 0)
        col = lax.broadcasted_iota(jnp.int32, y.shape, 1)
        flat = (base_row + row) * np.int32(d_model) + col
        h = _lowbias32(flat + seed * np.int32(_GOLD))
        # inverted dropout: keep with prob (1-p), scale kept values by 1/(1-p).
        bits = jnp.bitwise_and(h, np.int32(0x00FFFFFF))          # uniform in [0, 2^24)
        thr = np.int32(min(int(round(dropout_p * (1 << 24))), (1 << 24) - 1))
        keep = bits >= thr                                        # integer compare, no f32 convert
        y = jnp.where(keep, y * np.float32(1.0 / (1.0 - dropout_p)), np.float32(0.0))

    o_ref[...] = y.astype(o_ref.dtype)


# ----------------------------------------------------------------------------
# Wrapper
# ----------------------------------------------------------------------------
def positional_encoding_forward(x, pe_table, *, dropout_p=0.1, training=False, seed=0):
    """x: [B, S, D].  pe_table: [max_len, D].  Returns [B, S, D] (x.dtype)."""
    B, S, D = x.shape
    assert pe_table.shape[0] >= S and pe_table.shape[1] == D
    pe_slice = pe_table[:S, :].astype(x.dtype)      # self.pe[:, :x.size(1)]

    # --- tile the sequence axis: target ~2 MiB per tile (fits scoped VMEM with
    # --- x/out/pe double-buffered on v5e/v6e/v7x), rows rounded to sublane pack.
    itemsize = np.dtype(x.dtype).itemsize
    gran = max(8, 32 // itemsize)                   # 8 for f32, 16 for bf16
    ts = max(1, (2 << 20) // (D * itemsize))
    ts = min(ts, S)
    if ts >= gran:
        ts = (ts // gran) * gran
    else:
        ts = S                                      # tiny S: take it whole
    n_seq = pl.cdiv(S, ts)

    tile_bytes = ts * D * itemsize
    vmem_limit = int(min(56 << 20, max(16 << 20, 8 * tile_bytes + (2 << 20))))

    kernel = functools.partial(
        _pe_add_dropout_kernel,
        dropout_p=float(dropout_p), training=bool(training),
        seq_len=S, d_model=D, tile_rows=ts,
    )
    seed_arr = jnp.asarray([seed], dtype=jnp.int32)

    return pl.pallas_call(
        kernel,
        out_shape=jax.ShapeDtypeStruct((B, S, D), x.dtype),
        grid_spec=pltpu.PrefetchScalarGridSpec(
            num_scalar_prefetch=1,                  # seed lands in SMEM
            grid=(n_seq, B),                        # batch is the inner axis
            in_specs=[
                # x tile: changes every step
                pl.BlockSpec((None, ts, D), lambda si, b, seed: (b, si, 0)),
                # pe tile: constant along the inner (batch) axis -> fetched
                # once per seq tile (S*D bytes of pe traffic total).
                pl.BlockSpec((ts, D), lambda si, b, seed: (si, 0)),
            ],
            out_specs=pl.BlockSpec((None, ts, D), lambda si, b, seed: (b, si, 0)),
        ),
        compiler_params=pltpu.CompilerParams(
            dimension_semantics=("parallel", "parallel"),
            vmem_limit_bytes=vmem_limit,
        ),
    )(seed_arr, x, pe_slice)


# ----------------------------------------------------------------------------
# Demo / self-check
# ----------------------------------------------------------------------------
if __name__ == "__main__":
    d_model = 128        # lane-dense output (multiple of 128)
    max_len = 64
    batch, seq = 2, 32
    p = 0.1

    pe_table = make_positional_encoding_table(d_model, max_len=max_len)

    key = jax.random.PRNGKey(0)
    x = jax.random.normal(key, (batch, seq, d_model), dtype=jnp.float32)

    ref = x + pe_table[None, :seq, :]

    # Eval mode (dropout = identity) -> deterministic, checkable against ref.
    out_eval = positional_encoding_forward(x, pe_table, dropout_p=p, training=False)
    out_eval = jax.block_until_ready(out_eval)
    assert out_eval.shape == (batch, seq, d_model)
    assert jnp.allclose(out_eval, ref, atol=1e-5, rtol=1e-5)

    # Training mode (exercises in-kernel dropout path).
    out_train = positional_encoding_forward(
        x, pe_table, dropout_p=p, training=True, seed=123
    )
    out_train = jax.block_until_ready(out_train)
    assert out_train.shape == (batch, seq, d_model)

    # Every output element is either 0 (dropped) or (x+pe)/(1-p) (kept).
    scaled_ref = ref / (1.0 - p)
    dropped = (out_train == 0.0)
    kept_ok = jnp.isclose(out_train, scaled_ref, atol=1e-4, rtol=1e-4)
    assert bool(jnp.all(dropped | kept_ok))

    # Drop rate should be roughly p (very loose bounds to avoid flakiness).
    drop_frac = float(jnp.mean(dropped.astype(jnp.float32)))
    assert 0.02 < drop_frac < 0.30, drop_frac

    print("KERNEL_OK")
</pallas_src>

<mosaic_0001>
module attributes {stable_mosaic.version = 11 : i64} {
  func.func @_pe_add_dropout_kernel(%arg0: i32, %arg1: i32, %arg2: memref<1xi32, #tpu.memory_space<smem>>, %arg3: memref<1x32x128xf32, #tpu.memory_space<vmem>>, %arg4: memref<32x128xf32, #tpu.memory_space<vmem>>, %arg5: memref<1x32x128xf32, #tpu.memory_space<vmem>>) attributes {dimension_semantics = [#tpu.dimension_semantics<parallel>, #tpu.dimension_semantics<parallel>], iteration_bounds = array<i64: 1, 2>, scalar_prefetch = 1 : i64, scratch_operands = 0 : i64, tpu.core_type = #tpu.core_type<tc>, window_params = [{transform_indices = @transform_0, window_bounds = array<i64: 1, 32, 128>}, {transform_indices = @transform_1, window_bounds = array<i64: 32, 128>}, {transform_indices = @transform_2, window_bounds = array<i64: 1, 32, 128>}]} {
    %c0 = arith.constant 0 : index
    %c0_0 = arith.constant 0 : index
    %c0_1 = arith.constant 0 : index
    %0 = vector.load %arg3[%c0, %c0_0, %c0_1] : memref<1x32x128xf32, #tpu.memory_space<vmem>>, vector<1x32x128xf32>
    %1 = vector.shape_cast %0 : vector<1x32x128xf32> to vector<32x128xf32>
    %c0_2 = arith.constant 0 : index
    %c0_3 = arith.constant 0 : index
    %2 = vector.load %arg4[%c0_2, %c0_3] : memref<32x128xf32, #tpu.memory_space<vmem>>, vector<32x128xf32>
    %3 = arith.addf %1, %2 : vector<32x128xf32>
    %c0_4 = arith.constant 0 : index
    %c0_5 = arith.constant 0 : index
    %c0_6 = arith.constant 0 : index
    %4 = vector.load %arg5[%c0_4, %c0_5, %c0_6] : memref<1x32x128xf32, #tpu.memory_space<vmem>>, vector<1x32x128xf32>
    %5 = vector.shape_cast %4 : vector<1x32x128xf32> to vector<32x128xf32>
    %6 = vector.shape_cast %3 : vector<32x128xf32> to vector<1x32x128xf32>
    tpu.vector_store %arg5[%c0_4, %c0_5, %c0_6], %6 {strides = array<i32>} : memref<1x32x128xf32, #tpu.memory_space<vmem>>, vector<1x32x128xf32>,
    return
  }
  func.func @transform_0(%arg0: i32, %arg1: i32, %arg2: memref<1xi32, #tpu.memory_space<smem>>) -> (i32, i32, i32) {
    %c0_i32 = arith.constant 0 : i32
    %c0_i32_0 = arith.constant 0 : i32
    return %arg1, %arg0, %c0_i32 : i32, i32, i32
  }
  func.func @transform_1(%arg0: i32, %arg1: i32, %arg2: memref<1xi32, #tpu.memory_space<smem>>) -> (i32, i32) {
    %c0_i32 = arith.constant 0 : i32
    %c0_i32_0 = arith.constant 0 : i32
    return %arg0, %c0_i32 : i32, i32
  }
  func.func @transform_2(%arg0: i32, %arg1: i32, %arg2: memref<1xi32, #tpu.memory_space<smem>>) -> (i32, i32, i32) {
    %c0_i32 = arith.constant 0 : i32
    %c0_i32_0 = arith.constant 0 : i32
    return %arg1, %arg0, %c0_i32 : i32, i32, i32
  }
}

</mosaic_0001>

<bundles_post_ra>
// kernel: tpu_custom_call.1
= control target key start
LH: loop header
LB: loop body
LE: loop exit
PB: predicated region body
PF: predicated region fallthrough
CT: control target
= control target key end

     0   :  { %9 = vsyncpa [#allocation5], 0  ;;  %s789_s0 = inlined_call_operand.<no memory space> [shape: s32[1], index: 0, kind: input, shape index: {}]   ;;  %s790_s1 = inlined_call_operand.hbm [shape: f32[2,32,128], index: 1, kind: input, shape index: {}]   ;;  %s791_s2 = inlined_call_operand.hbm [shape: f32[32,128], index: 2, kind: input, shape index: {}]   ;;  %s792_s3 = inlined_call_operand.hbm [shape: f32[2,32,128], index: 3, kind: output, shape index: {}]  }
   0x1   :  { %11 = vsyncpa [#allocation5 + $0x1], 0 }
   0x2   :  { %12 = vsyncpa [#allocation8], 0 }
   0x3   :  { %13 = vsyncpa [#allocation6], 0 }
   0x4   :  { %15 = vsyncpa [#allocation6 + $0x1], 0  ;;  %s602_s12 = smov 0   ;;  %s604_s13 = smov 0  }
   0x5   :  { %s606_s14 = smov 0   ;;  %s608_s0 = smov 0  }
   0x6   :  { %s610_s15 = smov 0   ;;  %s612_s16 = smov 0  }
   0x7 LB: > { %s339_s17 = sadd.s32 4294967295, %s573_s16   ;;  %s340_s18 = sadd.s32 4294967294, %s573_s16   ;;  %s573_s16 = sphi %s612_s16, %s21_s16   ;;  %s569_s15 = sphi %s610_s15, %s812_s15   ;;  %s565_s0 = sphi %s608_s0, %s811_s0   ;;  %s561_s14 = sphi %s606_s14, %s810_s14   ;;  %s557_s13 = sphi %s604_s13, %s809_s13   ;;  %s553_s12 = sphi %s602_s12, %s808_s12  }
   0x8   : > { %p55_p0 = scmp.ne.s32.totalorder %s557_s13, %s553_s12  ;;  %p636_p1 = scmp.eq.s32.totalorder %s339_s17, 0 }
   0x9   : > { %p640_p2 = scmp.eq.s32.totalorder %s339_s17, 1  ;;  %p113_p3 = scmp.eq.s32.totalorder %s340_s18, 1 }
   0xa   : > { %p646_p4 = por %p636_p1, %p55_p0  ;;  %p341_p5 = scmp.ge.s32.totalorder %s573_s16, 1 }
   0xb   : > { %p651_p6 = por %p113_p3, %p55_p0  ;;  %p120_p7 = scmp.lt.s32.totalorder %s573_s16, 3 }
   0xc   : > { %s797_s21 = scalar_select %p646_p4, 1, 0 }
   0xd   : > { %s798_s22 = scalar_select %p651_p6, 1, 0 }
   0xe   : > { %p656_p8 = pnand %p341_p5, %p120_p7  ;;  %s575_s24 = smov [#allocation7]  }
   0xf   : > { %s135_s25 = sshll.u32 %s575_s24, 4  ;;  %s30_s27 = sadd.s32 1, %s569_s15  ;;  %s136_s25 = int_to_ptr.vmem [resolvable:$true] %s135_s25 }
  0x10   : > { %p366_p9 = pneg %p656_p8  ;;  %s446_s28 = scalar_lea.vmem %s136_s25, 512 }
  0x11   : > { %p447_p13 = scmp.ne.s32.totalorder %s136_s25, %s446_s28  ;;  %p454_p5 = scmp.lt.s32.totalorder %s136_s25, %s136_s25 }
  0x12   : > { %p665_p11 = pnand %p366_p9, %p636_p1  ;;  %p455_p7 = scmp.lt.s32.totalorder %s446_s28, %s446_s28 }
  0x14   : > { %p437_p12 = pneg %p665_p11  ;;  %p456_p6 = por %p455_p7, %p454_p5 }
  0x16   : > { %p449_p0 = pnand %p447_p13, %p437_p12 }
  0x18   : > { %p450_p3 = pneg %p449_p0 }
  0x1a   : > { %p457_p4 = pnand %p456_p6, %p450_p3 }
  0x1c   : > { %460 = shalt.err (!%p457_p4)
}
  0x1d   : > { %s794_s29 = smov 128   ;;  %s577_s30 = smov 8  }
  0x1e   : > { %369 = dma.hbm_to_vmem [thread:$0]  (!%p665_p11), %s791_s2, 512, %s136_s25, [#allocation8], %s794_s29, %s794_s29, %s577_s30  }
  0x1f   : > { %p31_p4 = scmp.ge.s32.totalorder %s30_s27, 2  ;;  %s42_s6 = sadd.s32 1, %s561_s14 }
  0x20   : > { %p49_p6 = scmp.ne.s32.totalorder %s561_s14, %s557_s13  ;;  %p50_p9 = scmp.eq.s32.totalorder %s573_s16, 0 }
  0x21   : > { %s814_s27 = smov (%p31_p4, %s30_s27), 0  ;;  %p379_p0 = scmp.lt.s32.totalorder %s573_s16, 2 }
  0x22   : > { %p686_p12 = por %p50_p9, %p49_p6  ;;  %p692_p13 = por %p640_p2, %p49_p6 }
  0x23   : > { %s37_s9 = ssub.s32 %s569_s15, %s814_s27  ;;  %s149_s10 = sand.u32 1, %s561_s14  }
  0x24   : > { %p40_p11 = scmp.eq.s32.totalorder %s37_s9, 0  ;;  %s344_s11 = sshll.u32 %s149_s10, 5 }
  0x25   : > { %s356_s18 = sshll.u32 %s569_s15, 9  ;;  %s153_s28 = scalar_lea.vmem [#allocation4], %s344_s11 }
  0x26   : > { %s701_s17 = scalar_select %p40_p11, %s561_s14, %s42_s6  }
  0x27   : > { %s161_s26 = scalar_lea.hbm %s790_s1, %s356_s18  ;;  %s162_s4 = sshll.u32 %s153_s28, 4  ;;  %s163_s4 = int_to_ptr.vmem [resolvable:$true] %s162_s4 }
  0x28   : > { %p709_p2 = pnand %p379_p0, %p686_p12  ;;  %s150_s5 = scalar_lea.sflag [#allocation5], %s149_s10 }
  0x29   : > { %s474_s9 = scalar_lea.vmem %s163_s4, 512  ;;  %s578_s6 = smov [#allocation4]  }
  0x2a   : > { %p463_p3 = pneg %p709_p2  ;;  %p475_p5 = scmp.ne.s32.totalorder %s163_s4, %s474_s9 }
  0x2b   : > { %s479_s29 = sshll.u32 %s578_s6, 4  ;;  %s480_s29 = int_to_ptr.vmem [resolvable:$false] %s479_s29 }
  0x2c   : > { %p477_p7 = pnand %p475_p5, %p463_p3  ;;  %s481_s18 = scalar_lea.vmem %s480_s29, 1024 }
  0x2d   : > { %p482_p6 = scmp.lt.s32.totalorder %s163_s4, %s480_s29  ;;  %p483_p9 = scmp.lt.s32.totalorder %s481_s18, %s474_s9 }
  0x2e   : > { %p478_p4 = pneg %p477_p7 }
  0x2f   : > { %p484_p11 = por %p483_p9, %p482_p6 }
  0x31   : > { %p485_p10 = pnand %p484_p11, %p478_p4 }
  0x33   : > { %488 = shalt.err (!%p485_p10)
}
  0x34   : > { %s804_s7 = smov 128   ;;  %174 = sbr.rel (%p656_p8) target bundleno = 85 (0x55), region = 28 }
  0x35   : > { %373 = dma.hbm_to_vmem [thread:$0]  (!%p709_p2), %s161_s26, 512, %s163_s4, %s150_s5, %s804_s7, %s804_s7, %s577_s30  }
  0x36   : > { %s723_s10 = sand.u32 (!%p656_p8), 1, %s557_s13   ;;  %p805_p12 = scmp.ne.s32.totalorder (!%p656_p8), %s797_s21, 0 }
  0x37   : > { %s348_s29 = sshll.u32 (!%p656_p8), %s723_s10, 5  ;;  %s177_s11 = scalar_lea.sflag (!%p656_p8), [#allocation5], %s723_s10 }
  0x38   : > { %s180_s24 = scalar_lea.vmem (!%p656_p8), [#allocation4], %s348_s29 }
  0x39   : > { %540 = dma.done.wait (%p805_p12), %s177_s11, 512  }
  0x3a   : > { %542 = vsyncadd (%p805_p12), %s177_s11, 4294966784 }
  0x3b   : > { %544 = dma.done.wait (%p636_p1), [#allocation8], 512  }
  0x3c   : > { %546 = vsyncadd (%p636_p1), [#allocation8], 4294966784  ;;  %s204_s23 = scalar_lea.vmem [#allocation9], %s348_s29  ;;  %s357_s25 = sshll.u32 %s565_s0, 9  ;;  %v208_v0 = vld [vmem:[%s180_s24] sm:$0xff]  ;;  %v209_v2 = vld [vmem:[%s180_s24 + $0x8] sm:$0xff] }
  0x3d   : > { %s240_s30 = sshll.u32 %s204_s23, 4  ;;  %v212_v1 = vld [vmem:[#allocation7] sm:$0xff]  ;;  %v213_v4 = vld [vmem:[#allocation7 + $0x8] sm:$0xff]  ;;  %v210_v5 = vld [vmem:[%s180_s24 + $0x10] sm:$0xff]  ;;  %s741_s0 = scalar_lea.hbm %s792_s3, %s357_s25  ;;  %s736_s30 = int_to_ptr.vmem [resolvable:$true] %s240_s30 }
  0x3e   : > { %v216_v3 = vadd.f32 %v212_v1, %v208_v0  ;;  %v214_v6 = vld [vmem:[#allocation7 + $0x10] sm:$0xff]  ;;  %v217_v7 = vadd.f32 %v213_v4, %v209_v2  ;;  %v211_v9 = vld [vmem:[%s180_s24 + $0x18] sm:$0xff]  ;;  %s225_s26 = scalar_lea.sflag [#allocation6], %s723_s10  ;;  %s489_s28 = scalar_lea.vmem %s736_s30, 512 }
  0x3f   : > { %v218_v8 = vadd.f32 %v214_v6, %v210_v5  ;;  %v215_v10 = vld [vmem:[#allocation7 + $0x18] sm:$0xff]  ;;  %p490_p1 = scmp.ne.s32.totalorder %s736_s30, %s489_s28  ;;  %s579_s4 = smov [#allocation9]  }
  0x40   : > { %220 = vst [vmem:[%s204_s23] sm:$0xff] %v216_v3  ;;  %v219_v11 = vadd.f32 %v215_v10, %v211_v9  ;;  %221 = vst [vmem:[%s204_s23 + $0x8] sm:$0xff] %v217_v7  ;;  %s493_s20 = sshll.u32 %s579_s4, 4  ;;  %s494_s20 = int_to_ptr.vmem [resolvable:$false] %s493_s20 }
  0x41   : > { %222 = vst [vmem:[%s204_s23 + $0x10] sm:$0xff] %v218_v8  ;;  %p491_p8 = pnand %p490_p1, %p692_p13  ;;  %s495_s5 = scalar_lea.vmem %s494_s20, 1024 }
  0x42   : > { %223 = vst [vmem:[%s204_s23 + $0x18] sm:$0xff] %v219_v11  ;;  %p496_p0 = scmp.lt.s32.totalorder %s736_s30, %s494_s20  ;;  %p497_p2 = scmp.lt.s32.totalorder %s495_s5, %s489_s28 }
  0x43   : > { %p492_p10 = pneg %p491_p8 }
  0x44   : > { %p498_p3 = por %p497_p2, %p496_p0 }
  0x46   : > { %p499_p5 = pnand %p498_p3, %p492_p10 }
  0x48   : > { %502 = shalt.err (!%p499_p5)
}
  0x49   : > { %s503_s9 = scalar_lea.hbm %s741_s0, 512  ;;  %s507_s7 = scalar_lea.hbm %s792_s3, 1024 }
  0x4a   : > { %p504_p7 = scmp.ne.s32.totalorder %s741_s0, %s503_s9  ;;  %p508_p9 = scmp.lt.s32.totalorder %s741_s0, %s792_s3 }
  0x4b   : > { %p509_p11 = scmp.lt.s32.totalorder %s507_s7, %s503_s9 }
  0x4c   : > { %p505_p4 = pnand %p504_p7, %p692_p13 }
  0x4d   : > { %p510_p12 = por %p509_p11, %p508_p9 }
  0x4e   : > { %p506_p6 = pneg %p505_p4 }
  0x50   : > { %p511_p1 = pnand %p510_p12, %p506_p6 }
  0x52   : > { %514 = shalt.err (!%p511_p1)
}
  0x53   : > { %s580_s24 = smov 128   ;;  %s581_s23 = smov 8  }
  0x54   : > { %364 = dma.vmem_to_hbm [thread:$0]  (%p692_p13), %s736_s30, 512, %s741_s0, %s225_s26, %s580_s24, %s580_s24, %s581_s23  }
  0x55 PF: > { %s255_s25 = sand.u32 1, %s553_s12   ;;  %p806_p8 = scmp.ne.s32.totalorder %s798_s22, 0 }
  0x56   : > { %p807_p10 = scmp.ge.s32.totalorder %s573_s16, 2  ;;  %s256_s19 = scalar_lea.sflag [#allocation6], %s255_s25 }
  0x58   : > { %p375_p0 = pnand %p807_p10, %p806_p8 }
  0x5a   : > { %p376_p2 = pneg %p375_p0 }
  0x5c   : > { %548 = dma.done.wait (%p376_p2), %s256_s19, 512  }
  0x5d   : > { %550 = vsyncadd (%p376_p2), %s256_s19, 4294966784  ;;  %s21_s16 = sadd.s32 1, %s573_s16   ;;  %s808_s12 = smov %s557_s13 }
  0x5e   : > { %p18_p3 = scmp.ge.s32.totalorder %s21_s16, 4   ;;  %s809_s13 = smov %s561_s14 }
  0x5f   : > { %s810_s14 = smov %s701_s17  ;;  %s811_s0 = smov %s569_s15 }
  0x60   : > { %s812_s15 = smov %s814_s27  ;;  %20 = sbr.rel (!%p18_p3) target bundleno = 7 (0x7), region = 78 }
  0x65   :  { %261 = vsyncpa [#allocation5], 1 }
  0x66   :  { %263 = vsyncpa [#allocation5 + $0x1], 1 }
  0x67   :  { %264 = vsyncpa [#allocation8], 1 }
  0x68   :  { %265 = vsyncpa [#allocation6], 1 }
  0x69   :  { %267 = vsyncpa [#allocation6 + $0x1], 1 }

</bundles_post_ra>
